<compile_context>
chip_gen: v7x
topology: tpu7x:2x2x1
jax: 0.10.0
libtpu: 0.0.40
codegen_flags: <defaults>
</compile_context>

<pallas_src>
import jax
import jax.numpy as jnp
from jax.experimental import pallas as pl
from jax.experimental.pallas import tpu as pltpu


def _mf_biased_kernel(gb_ref, uvec_ref, ivec_ref, ub_ref, ib_ref, out_ref):
    # gb_ref:   SMEM (1, 1)   global bias scalar
    # uvec_ref: VMEM (D, TB)  gathered user vectors (batch on the lane axis)
    # ivec_ref: VMEM (D, TB)  gathered item vectors
    # ub_ref:   VMEM (1, TB)  gathered user biases
    # ib_ref:   VMEM (1, TB)  gathered item biases
    # out_ref:  VMEM (1, TB)  predicted ratings (lane-dense)
    prod = uvec_ref[...] * ivec_ref[...]                      # VPU multiply
    dot = jnp.sum(prod, axis=0, keepdims=True)                # (1, TB) sublane reduce (XLU)
    out_ref[...] = gb_ref[0, 0] + ub_ref[...] + ib_ref[...] + dot


def mf_biased_forward(user_ids, item_ids, params, *, tile_b=512):
    """Pallas forward pass. Returns predicted ratings of shape (B,)."""
    user_emb = params["user_emb"]       # (U, D)
    item_emb = params["item_emb"]       # (I, D)
    user_bias = params["user_bias"]     # (U, 1)
    item_bias = params["item_bias"]     # (I, 1)
    global_bias = params["global_bias"]  # (1,)

    B = user_ids.shape[0]
    D = user_emb.shape[1]

    # Lane-align the batch tile and pad the batch instead of asserting on it.
    tile_b = max(128, (int(tile_b) // 128) * 128)
    b_lane = pl.cdiv(B, 128) * 128
    if b_lane <= tile_b:
        tile_b = b_lane                  # tiny batches: a single lane-aligned tile
    B_pad = pl.cdiv(B, tile_b) * tile_b
    pad = B_pad - B

    uid = jnp.pad(user_ids.astype(jnp.int32), (0, pad))   # pad with valid id 0
    iid = jnp.pad(item_ids.astype(jnp.int32), (0, pad))

    # Gathers (embedding lookups) stay in plain JAX; the transpose puts the
    # batch on the lane axis so every kernel load/reduce/store is lane-dense.
    # (A production variant would store the tables as (D, N) to avoid it.)
    user_vecs_t = jnp.take(user_emb, uid, axis=0).T                  # (D, B_pad)
    item_vecs_t = jnp.take(item_emb, iid, axis=0).T                  # (D, B_pad)
    user_b = jnp.take(user_bias[:, 0], uid, axis=0).reshape(1, B_pad)  # (1, B_pad)
    item_b = jnp.take(item_bias[:, 0], iid, axis=0).reshape(1, B_pad)  # (1, B_pad)
    gb = jnp.reshape(global_bias.astype(jnp.float32), (1, 1))          # (1, 1)

    grid = (B_pad // tile_b,)

    cost = pl.CostEstimate(
        flops=2 * B_pad * D + 3 * B_pad,
        transcendentals=0,
        bytes_accessed=4 * (2 * B_pad * D + 3 * B_pad + 1),
    )

    out = pl.pallas_call(
        _mf_biased_kernel,
        out_shape=jax.ShapeDtypeStruct((1, B_pad), jnp.float32),
        grid_spec=pltpu.PrefetchScalarGridSpec(
            num_scalar_prefetch=0,
            grid=grid,
            in_specs=[
                pl.BlockSpec(memory_space=pltpu.SMEM),            # global bias scalar
                pl.BlockSpec((D, tile_b), lambda i: (0, i)),      # user vecs (D, TB)
                pl.BlockSpec((D, tile_b), lambda i: (0, i)),      # item vecs (D, TB)
                pl.BlockSpec((1, tile_b), lambda i: (0, i)),      # user bias (1, TB)
                pl.BlockSpec((1, tile_b), lambda i: (0, i)),      # item bias (1, TB)
            ],
            out_specs=pl.BlockSpec((1, tile_b), lambda i: (0, i)),  # lane-dense output
        ),
        compiler_params=pltpu.CompilerParams(
            dimension_semantics=("parallel",)),
        cost_estimate=cost,
    )(gb, user_vecs_t, item_vecs_t, user_b, item_b)

    # Drop padding; matches PyTorch's .squeeze() -> (B,)
    return out[0, :B]


def init_params(key, num_users, num_items, embedding_dim=20, global_bias=0.0):
    k1, k2, k3, k4 = jax.random.split(key, 4)
    return {
        # torch.nn.Embedding default init: N(0, 1)
        "user_emb": jax.random.normal(k1, (num_users, embedding_dim), jnp.float32),
        "item_emb": jax.random.normal(k2, (num_items, embedding_dim), jnp.float32),
        "user_bias": jax.random.normal(k3, (num_users, 1), jnp.float32),
        "item_bias": jax.random.normal(k4, (num_items, 1), jnp.float32),
        "global_bias": jnp.array([global_bias], jnp.float32),
    }


def _reference(user_ids, item_ids, params):
    uv = jnp.take(params["user_emb"], user_ids, axis=0)
    iv = jnp.take(params["item_emb"], item_ids, axis=0)
    ub = jnp.take(params["user_bias"], user_ids, axis=0)[:, 0]
    ib = jnp.take(params["item_bias"], item_ids, axis=0)[:, 0]
    return params["global_bias"][0] + ub + ib + jnp.sum(uv * iv, axis=1)


if __name__ == "__main__":
    root = jax.random.PRNGKey(0)
    k_params, k_u1, k_i1, k_u2, k_i2 = jax.random.split(root, 5)

    num_users, num_items, embedding_dim = 64, 48, 20
    params = init_params(k_params, num_users, num_items, embedding_dim,
                         global_bias=0.25)

    # Small batch (exercises the single-tile, padded path; tile shrinks to 128).
    B1 = 16
    u1 = jax.random.randint(k_u1, (B1,), 0, num_users, dtype=jnp.int32)
    i1 = jax.random.randint(k_i1, (B1,), 0, num_items, dtype=jnp.int32)
    pred1 = jax.block_until_ready(mf_biased_forward(u1, i1, params))
    ref1 = _reference(u1, i1, params)
    assert pred1.shape == (B1,)
    assert jnp.allclose(pred1, ref1, atol=1e-5, rtol=1e-5)

    # Larger ragged batch (exercises multi-step grid + tail padding/slicing).
    B2 = 1000
    u2 = jax.random.randint(k_u2, (B2,), 0, num_users, dtype=jnp.int32)
    i2 = jax.random.randint(k_i2, (B2,), 0, num_items, dtype=jnp.int32)
    pred2 = jax.block_until_ready(mf_biased_forward(u2, i2, params, tile_b=512))
    ref2 = _reference(u2, i2, params)
    assert pred2.shape == (B2,)
    assert jnp.allclose(pred2, ref2, atol=1e-5, rtol=1e-5)

    print("KERNEL_OK")
</pallas_src>

<mosaic_0001>
module attributes {stable_mosaic.version = 11 : i64} {
  func.func @_mf_biased_kernel(%arg0: i32, %arg1: memref<1x1xf32, #tpu.memory_space<smem>>, %arg2: memref<20x128xf32, #tpu.memory_space<vmem>>, %arg3: memref<20x128xf32, #tpu.memory_space<vmem>>, %arg4: memref<1x128xf32, #tpu.memory_space<vmem>>, %arg5: memref<1x128xf32, #tpu.memory_space<vmem>>, %arg6: memref<1x128xf32, #tpu.memory_space<vmem>>) attributes {dimension_semantics = [#tpu.dimension_semantics<parallel>], iteration_bounds = array<i64: 1>, scalar_prefetch = 0 : i64, scratch_operands = 0 : i64, tpu.core_type = #tpu.core_type<tc>, window_params = [{transform_indices = @transform_0, window_bounds = array<i64: 1, 1>}, {transform_indices = @transform_1, window_bounds = array<i64: 20, 128>}, {transform_indices = @transform_2, window_bounds = array<i64: 20, 128>}, {transform_indices = @transform_3, window_bounds = array<i64: 1, 128>}, {transform_indices = @transform_4, window_bounds = array<i64: 1, 128>}, {transform_indices = @transform_5, window_bounds = array<i64: 1, 128>}]} {
    %c0 = arith.constant 0 : index
    %c0_0 = arith.constant 0 : index
    %0 = vector.load %arg2[%c0, %c0_0] : memref<20x128xf32, #tpu.memory_space<vmem>>, vector<20x128xf32>
    %c0_1 = arith.constant 0 : index
    %c0_2 = arith.constant 0 : index
    %1 = vector.load %arg3[%c0_1, %c0_2] : memref<20x128xf32, #tpu.memory_space<vmem>>, vector<20x128xf32>
    %2 = arith.mulf %0, %1 : vector<20x128xf32>
    %cst = arith.constant dense<0.000000e+00> : vector<128xf32>
    %3 = vector.multi_reduction <add>, %2, %cst [0] : vector<20x128xf32> to vector<128xf32>
    %4 = vector.shape_cast %3 : vector<128xf32> to vector<1x128xf32>
    %c0_3 = arith.constant 0 : index
    %c0_4 = arith.constant 0 : index
    %5 = memref.load %arg1[%c0_3, %c0_4] : memref<1x1xf32, #tpu.memory_space<smem>>
    %c0_5 = arith.constant 0 : index
    %c0_6 = arith.constant 0 : index
    %6 = vector.load %arg4[%c0_5, %c0_6] : memref<1x128xf32, #tpu.memory_space<vmem>>, vector<1x128xf32>
    %7 = vector.broadcast %5 : f32 to vector<1x128xf32>
    %8 = arith.addf %7, %6 : vector<1x128xf32>
    %c0_7 = arith.constant 0 : index
    %c0_8 = arith.constant 0 : index
    %9 = vector.load %arg5[%c0_7, %c0_8] : memref<1x128xf32, #tpu.memory_space<vmem>>, vector<1x128xf32>
    %10 = arith.addf %8, %9 : vector<1x128xf32>
    %11 = arith.addf %10, %4 : vector<1x128xf32>
    %c0_9 = arith.constant 0 : index
    %c0_10 = arith.constant 0 : index
    %12 = vector.load %arg6[%c0_9, %c0_10] : memref<1x128xf32, #tpu.memory_space<vmem>>, vector<1x128xf32>
    tpu.vector_store %arg6[%c0_9, %c0_10], %11 {strides = array<i32>} : memref<1x128xf32, #tpu.memory_space<vmem>>, vector<1x128xf32>,
    return
  }
  func.func @transform_0(%arg0: i32) -> (i32, i32) {
    %c0_i32 = arith.constant 0 : i32
    %c0_i32_0 = arith.constant 0 : i32
    %c0_i32_1 = arith.constant 0 : i32
    return %c0_i32, %c0_i32_0 : i32, i32
  }
  func.func @transform_1(%arg0: i32) -> (i32, i32) {
    %c0_i32 = arith.constant 0 : i32
    %c0_i32_0 = arith.constant 0 : i32
    return %c0_i32, %arg0 : i32, i32
  }
  func.func @transform_2(%arg0: i32) -> (i32, i32) {
    %c0_i32 = arith.constant 0 : i32
    %c0_i32_0 = arith.constant 0 : i32
    return %c0_i32, %arg0 : i32, i32
  }
  func.func @transform_3(%arg0: i32) -> (i32, i32) {
    %c0_i32 = arith.constant 0 : i32
    %c0_i32_0 = arith.constant 0 : i32
    return %c0_i32, %arg0 : i32, i32
  }
  func.func @transform_4(%arg0: i32) -> (i32, i32) {
    %c0_i32 = arith.constant 0 : i32
    %c0_i32_0 = arith.constant 0 : i32
    return %c0_i32, %arg0 : i32, i32
  }
  func.func @transform_5(%arg0: i32) -> (i32, i32) {
    %c0_i32 = arith.constant 0 : i32
    %c0_i32_0 = arith.constant 0 : i32
    return %c0_i32, %arg0 : i32, i32
  }
}

</mosaic_0001>

<bundles_post_ra>
// kernel: tpu_custom_call.1
= control target key start
LH: loop header
LB: loop body
LE: loop exit
PB: predicated region body
PF: predicated region fallthrough
CT: control target
= control target key end

     0   :  { %11 = vsyncpa [#allocation4], 0  ;;  %s250_s0 = inlined_call_operand.<no memory space> [shape: f32[1,1], index: 0, kind: input, shape index: {}]   ;;  %s251_s1 = inlined_call_operand.hbm [shape: f32[20,128], index: 1, kind: input, shape index: {}]   ;;  %s252_s2 = inlined_call_operand.hbm [shape: f32[20,128], index: 2, kind: input, shape index: {}]   ;;  %s253_s3 = inlined_call_operand.vmem [shape: f32[1,128], index: 3, kind: input, shape index: {}]   ;;  %s254_s4 = inlined_call_operand.vmem [shape: f32[1,128], index: 4, kind: input, shape index: {}]   ;;  %s255_s5 = inlined_call_operand.hbm [shape: f32[1,128], index: 5, kind: output, shape index: {}]  }
   0x1   :  { %12 = vsyncpa [#allocation7], 0 }
   0x2   :  { %13 = vsyncpa [#allocation5], 0  ;;  %s170_s18 = smov [#allocation3]   ;;  %s98_s22 = scalar_lea.hbm %s251_s1, 384 }
   0x3   :  { %s21_s19 = sshll.u32 %s170_s18, 4  ;;  %p99_p0 = scmp.ne.s32.totalorder %s251_s1, %s98_s22  ;;  %s22_s19 = int_to_ptr.vmem [resolvable:$true] %s21_s19 }
   0x4   :  { %p102_p1 = scmp.lt.u32.totalorder %s98_s22, %s251_s1 }
   0x6   :  { %p104_p2 = pnand %p102_p1, %p99_p0 }
   0x8   :  { %107 = shalt.err (!%p104_p2)
}
   0x9   :  { %s108_s27 = scalar_lea.vmem %s22_s19, 384  ;;  %p113_p4 = scmp.lt.s32.totalorder %s22_s19, %s22_s19 }
   0xa   :  { %p109_p3 = scmp.ne.s32.totalorder %s22_s19, %s108_s27  ;;  %p114_p5 = scmp.lt.s32.totalorder %s108_s27, %s108_s27 }
   0xc   :  { %p115_p6 = por %p114_p5, %p113_p4 }
   0xe   :  { %p116_p7 = pnand %p115_p6, %p109_p3 }
  0x10   :  { %119 = shalt.err (!%p116_p7)
}
  0x11   :  { %s171_s28 = smov 128   ;;  %s172_s29 = smov 8  }
  0x12   :  { %27 = dma.hbm_to_vmem [thread:$0]  %s251_s1, 384, %s22_s19, [#allocation4], %s171_s28, %s171_s28, %s172_s29  }
  0x13   :  { %s173_s7 = smov [#allocation6]   ;;  %s120_s11 = scalar_lea.hbm %s252_s2, 384 }
  0x14   :  { %s33_s8 = sshll.u32 %s173_s7, 4  ;;  %p121_p8 = scmp.ne.s32.totalorder %s252_s2, %s120_s11  ;;  %s34_s8 = int_to_ptr.vmem [resolvable:$true] %s33_s8 }
  0x15   :  { %p124_p9 = scmp.lt.u32.totalorder %s120_s11, %s252_s2 }
  0x17   :  { %p126_p10 = pnand %p124_p9, %p121_p8 }
  0x19   :  { %129 = shalt.err (!%p126_p10)
}
  0x1a   :  { %s130_s16 = scalar_lea.vmem %s34_s8, 384  ;;  %p135_p12 = scmp.lt.s32.totalorder %s34_s8, %s34_s8 }
  0x1b   :  { %p131_p11 = scmp.ne.s32.totalorder %s34_s8, %s130_s16  ;;  %p136_p13 = scmp.lt.s32.totalorder %s130_s16, %s130_s16 }
  0x1d   :  { %p137_p0 = por %p136_p13, %p135_p12 }
  0x1f   :  { %p138_p1 = pnand %p137_p0, %p131_p11 }
  0x21   :  { %141 = shalt.err (!%p138_p1)
}
  0x22   :  { %39 = dma.hbm_to_vmem [thread:$0]  %s252_s2, 384, %s34_s8, [#allocation7], %s171_s28, %s171_s28, %s172_s29  }
  0x23   :  { %164 = dma.done.wait [#allocation4], 384  }
  0x24   :  { %165 = vsyncadd [#allocation4], 4294966912 }
  0x25   :  { %166 = dma.done.wait [#allocation7], 384  }
  0x26   :  { %167 = vsyncadd [#allocation7], 4294966912  ;;  %v50_v0 = vld [vmem:[#allocation3] sm:$0xff]  ;;  %v51_v1 = vld [vmem:[#allocation3 + $0x8] sm:$0xff]  ;;  %vm60_vm0 = vcmask 1043456   ;;  %v71_v14 = vstv %s250_s0  ;;  %s174_s23 = smov [#allocation8]  }
  0x27   :  { %v52_v2 = vld [vmem:[#allocation3 + $0x10] sm:$0xf]  ;;  %v53_v3 = vld [vmem:[#allocation6] sm:$0xff]  ;;  %v54_v4 = vld [vmem:[#allocation6 + $0x8] sm:$0xff]  ;;  %s83_s24 = sshll.u32 %s174_s23, 4  ;;  %s84_s24 = int_to_ptr.vmem [resolvable:$true] %s83_s24 }
  0x28   :  { %v55_v5 = vld [vmem:[#allocation6 + $0x10] sm:$0xf]  ;;  %v56_v6 = vmul.f32 %v53_v3, %v50_v0  ;;  %v57_v7 = vmul.f32 %v54_v4, %v51_v1  ;;  %v70_v13 = vld [vmem:[%s253_s3] sm:$0x1]  ;;  %s142_s3 = scalar_lea.vmem %s84_s24, 16  ;;  %s146_s25 = scalar_lea.vmem %s84_s24, 32 }
  0x29   :  { %v58_v8 = vmul.f32 %v55_v5, %v52_v2  ;;  %v72_v17 = vadd.f32 %v71_v14, %v70_v13  ;;  %v73_v18 = vld [vmem:[%s254_s4] sm:$0x1]  ;;  %p143_p2 = scmp.ne.s32.totalorder %s84_s24, %s142_s3  ;;  %p147_p3 = scmp.lt.s32.totalorder %s84_s24, %s84_s24 }
  0x2a   :  { %v59_v9 = vadd.f32 %v57_v7, %v56_v6  ;;  %p148_p4 = scmp.lt.s32.totalorder %s146_s25, %s142_s3 }
  0x2b   :  { %v61_v10 = vsel %vm60_vm0, %v58_v8, 0.0  ;;  %v74_v21 = vadd.f32 %v73_v18, %v72_v17 }
  0x2c   :  { %v62_v11 = vadd.f32 %v61_v10, %v59_v9  ;;  %p149_p5 = por %p148_p4, %p147_p3 }
  0x2e   :  { %v63_v12 = vrot.slane %v62_v11, 4  ;;  %p150_p6 = pnand %p149_p5, %p143_p2 }
  0x30   :  { %v64_v15 = vadd.f32 %v63_v12, %v62_v11 }
  0x32   :  { %v65_v16 = vrot.slane %v64_v15, 2 }
  0x34   :  { %v66_v19 = vadd.f32 %v65_v16, %v64_v15 }
  0x36   :  { %v67_v20 = vrot.slane %v66_v19, 1 }
  0x38   :  { %v68_v22 = vadd.f32 %v67_v20, %v66_v19 }
  0x3a   :  { %v75_v23 = vadd.f32 %v74_v21, %v68_v22 }
  0x3c   :  { %76 = vst [vmem:[#allocation8] sm:$0x1] %v75_v23 }
  0x3d   :  { %153 = shalt.err (!%p150_p6)
}
  0x3e   :  { %s154_s4 = scalar_lea.hbm %s255_s5, 16 }
  0x3f   :  { %p155_p7 = scmp.ne.s32.totalorder %s255_s5, %s154_s4  ;;  %p158_p8 = scmp.lt.u32.totalorder %s154_s4, %s255_s5 }
  0x41   :  { %p160_p9 = pnand %p158_p8, %p155_p7 }
  0x43   :  { %163 = shalt.err (!%p160_p9)
}
  0x44   :  { %86 = dma.vmem_to_hbm [thread:$0]  %s84_s24, 16, %s255_s5, [#allocation5]  }
  0x45   :  { %168 = dma.done.wait [#allocation5], 16  }
  0x46   :  { %169 = vsyncadd [#allocation5], 4294967280 }
  0x47   :  { %90 = vsyncpa [#allocation4], 1 }
  0x48   :  { %91 = vsyncpa [#allocation7], 1 }
  0x49   :  { %92 = vsyncpa [#allocation5], 1 }

</bundles_post_ra>
